<compile_context>
chip_gen: v6e
topology: v6e:2x2x1
jax: 0.10.0
libtpu: 0.0.40
codegen_flags: <defaults>
</compile_context>

<pallas_src>
import functools

import jax
import jax.numpy as jnp
from jax import lax
from jax.experimental import pallas as pl
from jax.experimental.pallas import tpu as pltpu

_INV_SQRT2 = 0.7071067811865476  # 1/sqrt(2)


def _mlp_kernel(w1_ref, b1_ref, w2_ref, b2_ref, x_ref, o_ref, *, approximate):
    # x_ref : (tr, 128)  -- 32 batch rows per 128-lane vreg row (4 feats each)
    # w1_ref: (128, 512) = kron(I_32, W1^T);  b1_ref: (1, 512) tiled bias
    # w2_ref: (512, 128) = kron(I_32, W2^T);  b2_ref: (1, 128) tiled bias
    # o_ref : (tr, 128)
    h = jnp.dot(x_ref[...], w1_ref[...],
                preferred_element_type=jnp.float32) + b1_ref[...]
    if approximate:
        # tanh approximation -> EUP slot (otherwise idle); slight deviation
        # from torch.nn.GELU(approximate='none').
        h = jax.nn.gelu(h, approximate=True)
    else:
        # exact erf-based GELU: matches torch.nn.GELU() default semantics.
        h = 0.5 * h * (1.0 + lax.erf(h * _INV_SQRT2))
    y = jnp.dot(h, w2_ref[...],
                preferred_element_type=jnp.float32) + b2_ref[...]
    o_ref[...] = y.astype(o_ref.dtype)


def mlp_forward(x, w1, b1, w2, b2, *, tb=32768, min_grid_steps=2,
                approximate_gelu=False):
    """x: (B, 4); w1: (16, 4); b1: (16,); w2: (4, 16); b2: (4,) -> (B, 4).

    tb = target batch elements per grid step (lane-aligned, feedback #1).
    """
    B, d_in = x.shape
    d_h = w1.shape[0]
    d_out = w2.shape[0]
    assert 128 % d_in == 0
    pack = 128 // d_in            # 32 batch rows packed per 128-lane row
    wi = pack * d_in              # 128  packed input row width
    wh = pack * d_h               # 512  packed hidden row width
    wo = pack * d_out             # 128  packed output row width

    # Block-diagonal packed weights so the compute is transpose-free and the
    # contraction dims (128 / 512) are proper MXU shapes (feedback #2, #6, #7).
    eye = jnp.eye(pack, dtype=x.dtype)
    w1p = jnp.kron(eye, w1.T)            # (128, 512)
    w2p = jnp.kron(eye, w2.T)            # (512, 128)
    b1p = jnp.tile(b1, pack)[None, :]    # (1, 512)
    b2p = jnp.tile(b2, pack)[None, :]    # (1, 128)

    # Pad batch only to a multiple of `pack` (tiny, and only when needed).
    # Tile-divisibility along rows is left to Pallas partial-block masking
    # instead of a full jnp.pad pass over x (feedback #2, #8).
    b_pad = pl.cdiv(B, pack) * pack
    xq = x if b_pad == B else jnp.pad(x, ((0, b_pad - B), (0, 0)))
    rows = b_pad // pack
    xp = xq.reshape(rows, wi)            # bitcast reshape: no HBM copy

    # Row tile: as large as tb allows (feedback #1), but force >= 2 grid steps
    # when possible so v7x's two TensorCores both get work (feedback #4).
    tr = max(8, (tb // pack) // 8 * 8)
    if rows <= 8:
        tr_eff = rows                    # single full-extent block
    else:
        tr_eff = max(8, min(tr, (pl.cdiv(rows, min_grid_steps) // 8) * 8))
    grid = (pl.cdiv(rows, tr_eff),)

    out_packed = pl.pallas_call(
        functools.partial(_mlp_kernel, approximate=approximate_gelu),
        out_shape=jax.ShapeDtypeStruct((rows, wo), x.dtype),
        grid=grid,
        in_specs=[
            # Packed params: constant index map -> fetched once, stay resident.
            pl.BlockSpec((wi, wh), lambda i: (0, 0)),
            pl.BlockSpec((1, wh), lambda i: (0, 0)),
            pl.BlockSpec((wh, wo), lambda i: (0, 0)),
            pl.BlockSpec((1, wo), lambda i: (0, 0)),
            # Lane-dense batch tiles (feedback #9: full-width vld/vst).
            pl.BlockSpec((tr_eff, wi), lambda i: (i, 0)),
        ],
        out_specs=pl.BlockSpec((tr_eff, wo), lambda i: (i, 0)),
        compiler_params=pltpu.CompilerParams(
            # Batch tiles are independent -> shard across v7x's 2 TCs.
            dimension_semantics=("parallel",),
        ),
    )(w1p, b1p, w2p, b2p, xp)

    y = out_packed.reshape(b_pad, d_out)  # bitcast reshape: no HBM copy
    return y if b_pad == B else y[:B]


def init_params(key):
    # nn.Linear natural shapes: fc1.weight (16,4), fc1.bias (16),
    #                           fc2.weight (4,16), fc2.bias (4)
    k1, k2, k3, k4 = jax.random.split(key, 4)
    w1 = jax.random.normal(k1, (16, 4), jnp.float32) * 0.1
    b1 = jax.random.normal(k2, (16,), jnp.float32) * 0.1
    w2 = jax.random.normal(k3, (4, 16), jnp.float32) * 0.1
    b2 = jax.random.normal(k4, (4,), jnp.float32) * 0.1
    return w1, b1, w2, b2


if __name__ == "__main__":
    key = jax.random.PRNGKey(0)
    kx, kp = jax.random.split(key)

    # Small batch of 4-feature rows (fc1 in_features=4).  B=1024 is a multiple
    # of 32 (zero wrapper copies) and yields a 2-step grid, exercising the
    # multi-tile / partial-masking path while staying tiny.
    B = 1024
    x = jax.random.normal(kx, (B, 4), jnp.float32)
    w1, b1, w2, b2 = init_params(kp)

    out = mlp_forward(x, w1, b1, w2, b2)
    jax.block_until_ready(out)

    # pure-JAX reference (PyTorch convention: y = x @ W^T + b, exact GELU)
    h_ref = jnp.dot(x, w1.T, precision=lax.Precision.HIGHEST) + b1
    h_ref = 0.5 * h_ref * (1.0 + lax.erf(h_ref / jnp.sqrt(2.0)))
    y_ref = jnp.dot(h_ref, w2.T, precision=lax.Precision.HIGHEST) + b2

    assert out.shape == (B, 4)
    # Tolerance covers the MXU's multi-pass f32 matmul decomposition.
    assert jnp.allclose(out, y_ref, atol=1e-3, rtol=1e-3), \
        float(jnp.max(jnp.abs(out - y_ref)))

    print("KERNEL_OK")
</pallas_src>

<mosaic_0001>
module attributes {stable_mosaic.version = 11 : i64} {
  func.func @_mlp_kernel(%arg0: i32, %arg1: memref<128x512xf32, #tpu.memory_space<vmem>>, %arg2: memref<1x512xf32, #tpu.memory_space<vmem>>, %arg3: memref<512x128xf32, #tpu.memory_space<vmem>>, %arg4: memref<1x128xf32, #tpu.memory_space<vmem>>, %arg5: memref<16x128xf32, #tpu.memory_space<vmem>>, %arg6: memref<16x128xf32, #tpu.memory_space<vmem>>) attributes {dimension_semantics = [#tpu.dimension_semantics<parallel>], iteration_bounds = array<i64: 2>, scalar_prefetch = 0 : i64, scratch_operands = 0 : i64, tpu.core_type = #tpu.core_type<tc>, window_params = [{pipeline_mode = #tpu.pipeline_mode<synchronous>, transform_indices = @transform_0, window_bounds = array<i64: 128, 512>}, {pipeline_mode = #tpu.pipeline_mode<synchronous>, transform_indices = @transform_1, window_bounds = array<i64: 1, 512>}, {pipeline_mode = #tpu.pipeline_mode<synchronous>, transform_indices = @transform_2, window_bounds = array<i64: 512, 128>}, {pipeline_mode = #tpu.pipeline_mode<synchronous>, transform_indices = @transform_3, window_bounds = array<i64: 1, 128>}, {transform_indices = @transform_4, window_bounds = array<i64: 16, 128>}, {transform_indices = @transform_5, window_bounds = array<i64: 16, 128>}]} {
    %c0 = arith.constant 0 : index
    %c0_0 = arith.constant 0 : index
    %0 = vector.load %arg5[%c0, %c0_0] : memref<16x128xf32, #tpu.memory_space<vmem>>, vector<16x128xf32>
    %c0_1 = arith.constant 0 : index
    %c0_2 = arith.constant 0 : index
    %1 = vector.load %arg1[%c0_1, %c0_2] : memref<128x512xf32, #tpu.memory_space<vmem>>, vector<128x512xf32>
    %cst = arith.constant dense<0.000000e+00> : vector<16x512xf32>
    %2 = tpu.matmul %0, %1, %cst {dimension_numbers = #tpu.dot_dimension_numbers<[1], [0], [0], [1], [0, 0, 1, 1], [], []>} : vector<16x128xf32>, vector<128x512xf32>, vector<16x512xf32> -> vector<16x512xf32>
    %c0_3 = arith.constant 0 : index
    %c0_4 = arith.constant 0 : index
    %3 = vector.load %arg2[%c0_3, %c0_4] : memref<1x512xf32, #tpu.memory_space<vmem>>, vector<1x512xf32>
    %4 = vector.broadcast %3 : vector<1x512xf32> to vector<16x512xf32>
    %5 = arith.addf %2, %4 : vector<16x512xf32>
    %cst_5 = arith.constant 5.000000e-01 : f32
    %6 = vector.broadcast %cst_5 : f32 to vector<16x512xf32>
    %7 = arith.mulf %6, %5 : vector<16x512xf32>
    %cst_6 = arith.constant 0.707106769 : f32
    %8 = vector.broadcast %cst_6 : f32 to vector<16x512xf32>
    %9 = arith.mulf %5, %8 : vector<16x512xf32>
    %10 = math.erf %9 : vector<16x512xf32>
    %cst_7 = arith.constant 1.000000e+00 : f32
    %11 = vector.broadcast %cst_7 : f32 to vector<16x512xf32>
    %12 = arith.addf %11, %10 : vector<16x512xf32>
    %13 = arith.mulf %7, %12 : vector<16x512xf32>
    %c0_8 = arith.constant 0 : index
    %c0_9 = arith.constant 0 : index
    %14 = vector.load %arg3[%c0_8, %c0_9] : memref<512x128xf32, #tpu.memory_space<vmem>>, vector<512x128xf32>
    %cst_10 = arith.constant dense<0.000000e+00> : vector<16x128xf32>
    %15 = tpu.matmul %13, %14, %cst_10 {dimension_numbers = #tpu.dot_dimension_numbers<[1], [0], [0], [1], [0, 0, 1, 1], [], []>} : vector<16x512xf32>, vector<512x128xf32>, vector<16x128xf32> -> vector<16x128xf32>
    %c0_11 = arith.constant 0 : index
    %c0_12 = arith.constant 0 : index
    %16 = vector.load %arg4[%c0_11, %c0_12] : memref<1x128xf32, #tpu.memory_space<vmem>>, vector<1x128xf32>
    %17 = vector.broadcast %16 : vector<1x128xf32> to vector<16x128xf32>
    %18 = arith.addf %15, %17 : vector<16x128xf32>
    %c0_13 = arith.constant 0 : index
    %c0_14 = arith.constant 0 : index
    %19 = vector.load %arg6[%c0_13, %c0_14] : memref<16x128xf32, #tpu.memory_space<vmem>>, vector<16x128xf32>
    tpu.vector_store %arg6[%c0_13, %c0_14], %18 {strides = array<i32>} : memref<16x128xf32, #tpu.memory_space<vmem>>, vector<16x128xf32>,
    return
  }
  func.func @transform_0(%arg0: i32) -> (i32, i32) {
    %c0_i32 = arith.constant 0 : i32
    %c0_i32_0 = arith.constant 0 : i32
    %c0_i32_1 = arith.constant 0 : i32
    return %c0_i32, %c0_i32_0 : i32, i32
  }
  func.func @transform_1(%arg0: i32) -> (i32, i32) {
    %c0_i32 = arith.constant 0 : i32
    %c0_i32_0 = arith.constant 0 : i32
    %c0_i32_1 = arith.constant 0 : i32
    return %c0_i32, %c0_i32_0 : i32, i32
  }
  func.func @transform_2(%arg0: i32) -> (i32, i32) {
    %c0_i32 = arith.constant 0 : i32
    %c0_i32_0 = arith.constant 0 : i32
    %c0_i32_1 = arith.constant 0 : i32
    return %c0_i32, %c0_i32_0 : i32, i32
  }
  func.func @transform_3(%arg0: i32) -> (i32, i32) {
    %c0_i32 = arith.constant 0 : i32
    %c0_i32_0 = arith.constant 0 : i32
    %c0_i32_1 = arith.constant 0 : i32
    return %c0_i32, %c0_i32_0 : i32, i32
  }
  func.func @transform_4(%arg0: i32) -> (i32, i32) {
    %c0_i32 = arith.constant 0 : i32
    %c0_i32_0 = arith.constant 0 : i32
    return %arg0, %c0_i32 : i32, i32
  }
  func.func @transform_5(%arg0: i32) -> (i32, i32) {
    %c0_i32 = arith.constant 0 : i32
    %c0_i32_0 = arith.constant 0 : i32
    return %arg0, %c0_i32 : i32, i32
  }
}

</mosaic_0001>

<bundles_post_ra>
// kernel: tpu_custom_call.1
= control target key start
LH: loop header
LB: loop body
LE: loop exit
PB: predicated region body
PF: predicated region fallthrough
CT: control target
= control target key end

     0   :  { %10 = vsyncpa [#allocation3], 0  ;;  %s1552_s0 = inlined_call_operand.hbm [shape: f32[128,512], index: 0, kind: input, shape index: {}]   ;;  %s1553_s1 = inlined_call_operand.hbm [shape: f32[1,512], index: 1, kind: input, shape index: {}]   ;;  %s1554_s2 = inlined_call_operand.hbm [shape: f32[512,128], index: 2, kind: input, shape index: {}]   ;;  %s1555_s3 = inlined_call_operand.vmem [shape: f32[1,128], index: 3, kind: input, shape index: {}]   ;;  %s1556_s4 = inlined_call_operand.hbm [shape: f32[32,128], index: 4, kind: input, shape index: {}]   ;;  %s1557_s5 = inlined_call_operand.hbm [shape: f32[32,128], index: 5, kind: output, shape index: {}]  }
   0x1   :  { %11 = vsyncpa [#allocation6], 0 }
   0x2   :  { %12 = vsyncpa [#allocation9], 0 }
   0x3   :  { %14 = vsyncpa [#allocation9 + $0x1], 0 }
   0x4   :  { %15 = vsyncpa [#allocation4], 0 }
   0x5   :  { %17 = vsyncpa [#allocation4 + $0x1], 0  ;;  %s1331_s18 = smov 0   ;;  %s1333_s19 = smov 0  }
   0x6   :  { %s1335_s20 = smov 0   ;;  %s1337_s21 = smov 0  }
   0x7 LB: > { %s1352_s22 = sadd.s32 4294967295, %s1287_s21   ;;  %s910_s23 = sadd.s32 4294967294, %s1287_s21   ;;  %s1287_s21 = sphi %s1337_s21, %s1583_s21   ;;  %s1283_s20 = sphi %s1335_s20, %s1582_s20   ;;  %s1279_s19 = sphi %s1333_s19, %s1581_s19   ;;  %s1275_s18 = sphi %s1331_s18, %s1580_s18  }
   0x8   : > { %p127_p0 = scmp.ne.s32.totalorder %s1279_s19, %s1275_s18  ;;  %p1558_p1 = scmp.eq.s32.totalorder %s1352_s22, 0 }
   0x9   : > { %p157_p3 = scmp.eq.s32.totalorder %s910_s23, 1  ;;  %p911_p5 = scmp.ge.s32.totalorder %s1287_s21, 1 }
   0xa   : > { %p1361_p4 = por %p1558_p1, %p127_p0  ;;  %p164_p7 = scmp.lt.s32.totalorder %s1287_s21, 3 }
   0xb   : > { %p1366_p6 = por %p157_p3, %p127_p0  ;;  %s1289_s27 = smov [#allocation5]  }
   0xc   : > { %s1563_s24 = scalar_select %p1361_p4, 1, 0 }
   0xd   : > { %s1564_s25 = scalar_select %p1366_p6, 1, 0 }
   0xe   : > { %p1371_p8 = pnand %p911_p5, %p164_p7  ;;  %s190_s28 = sshll.u32 %s1289_s27, 4  ;;  %s191_s28 = int_to_ptr.vmem [resolvable:$true] %s190_s28 }
   0xf   : > { %s1290_s29 = smov [#allocation2]   ;;  %s1291_s7 = smov [#allocation7]  }
  0x10   : > { %s1565_s26 = scalar_select %p1371_p8, 1, 0 }
  0x11   : > { %p1025_p10 = pneg %p1371_p8  ;;  %s176_s30 = sshll.u32 %s1290_s29, 4  ;;  %s177_s30 = int_to_ptr.vmem [resolvable:$true] %s176_s30 }
  0x12   : > { %s200_s8 = sshll.u32 %s1291_s7, 4  ;;  %s1120_s9 = scalar_lea.vmem %s191_s28, 64  ;;  %s201_s8 = int_to_ptr.vmem [resolvable:$true] %s200_s8 }
  0x13   : > { %p1380_p11 = pnand %p1025_p10, %p1558_p1  ;;  %p1121_p13 = scmp.ne.s32.totalorder %s191_s28, %s1120_s9 }
  0x14   : > { %p1128_p5 = scmp.lt.s32.totalorder %s191_s28, %s191_s28  ;;  %p1129_p7 = scmp.lt.s32.totalorder %s1120_s9, %s1120_s9 }
  0x15   : > { %p1111_p12 = pneg %p1380_p11 }
  0x16   : > { %p1130_p9 = por %p1129_p7, %p1128_p5 }
  0x17   : > { %p1123_p0 = pnand %p1121_p13, %p1111_p12 }
  0x19   : > { %p1124_p3 = pneg %p1123_p0 }
  0x1b   : > { %p1131_p10 = pnand %p1130_p9, %p1124_p3 }
  0x1d   : > { %1134 = shalt.err (!%p1131_p10)
}
  0x1e   : > { %1031 = dma.hbm_to_vmem [thread:$0]  (!%p1380_p11), %s1553_s1, 64, %s191_s28, [#allocation6]  }
  0x1f   : > { %s1146_s12 = scalar_lea.vmem %s177_s30, 8192  ;;  %p1154_p13 = scmp.lt.s32.totalorder %s177_s30, %s177_s30 }
  0x20   : > { %p1147_p1 = scmp.ne.s32.totalorder %s177_s30, %s1146_s12  ;;  %p1155_p0 = scmp.lt.s32.totalorder %s1146_s12, %s1146_s12 }
  0x22   : > { %p1149_p2 = pnand %p1147_p1, %p1111_p12  ;;  %p1156_p4 = por %p1155_p0, %p1154_p13 }
  0x24   : > { %p1150_p6 = pneg %p1149_p2 }
  0x26   : > { %p1157_p8 = pnand %p1156_p4, %p1150_p6 }
  0x28   : > { %1160 = shalt.err (!%p1157_p8)
}
  0x29   : > { %s1292_s13 = smov 512   ;;  %s1293_s14 = smov 32  }
  0x2a   : > { %1028 = dma.hbm_to_vmem [thread:$0]  (!%p1380_p11), %s1552_s0, 8192, %s177_s30, [#allocation3], %s1292_s13, %s1292_s13, %s1293_s14  }
  0x2b   : > { %s1172_s17 = scalar_lea.vmem %s201_s8, 8192  ;;  %p1180_p3 = scmp.lt.s32.totalorder %s201_s8, %s201_s8 }
  0x2c   : > { %p1173_p9 = scmp.ne.s32.totalorder %s201_s8, %s1172_s17  ;;  %p1181_p5 = scmp.lt.s32.totalorder %s1172_s17, %s1172_s17 }
  0x2e   : > { %p1175_p1 = pnand %p1173_p9, %p1111_p12  ;;  %p1182_p4 = por %p1181_p5, %p1180_p3 }
  0x30   : > { %p1176_p2 = pneg %p1175_p1 }
  0x32   : > { %p1183_p6 = pnand %p1182_p4, %p1176_p2 }
  0x34   : > { %1186 = shalt.err (!%p1183_p6)
}
  0x35   : > { %s1561_s23 = smov 128   ;;  %s1295_s27 = smov 8  }
  0x36   : > { %1034 = dma.hbm_to_vmem [thread:$0]  (!%p1380_p11), %s1554_s2, 8192, %s201_s8, [#allocation6], %s1561_s23, %s1561_s23, %s1295_s27  }
  0x37   : > { %s1414_s30 = sadd.s32 1, %s1287_s21   ;;  %s114_s9 = sadd.s32 1, %s1283_s20 }
  0x38   : > { %s111_s7 = ssub.s32 %s1287_s21, %s1414_s30  ;;  %p121_p12 = scmp.ne.s32.totalorder %s1283_s20, %s1279_s19 }
  0x39   : > { %p112_p8 = scmp.eq.s32.totalorder %s111_s7, 0  ;;  %p122_p7 = scmp.eq.s32.totalorder %s1287_s21, 0 }
  0x3a   : > { %p1046_p10 = scmp.lt.s32.totalorder %s1287_s21, 2  ;;  %p1567_p0 = scmp.eq.s32.totalorder %s1352_s22, 1 }
  0x3b   : > { %s1424_s10 = scalar_select %p112_p8, %s1283_s20, %s114_s9  }
  0x3c   : > { %p123_p13 = por %p122_p7, %p121_p12  ;;  %p1428_p9 = por %p1567_p0, %p121_p12 }
  0x3d   : > { %s217_s11 = sand.u32 1, %s1283_s20   ;;  %s931_s12 = sshll.u32 %s1287_s21, 8 }
  0x3e   : > { %s1568_s6 = scalar_select %p1428_p9, 1, 0 }
  0x3f   : > { %s916_s8 = sshll.u32 %s217_s11, 4  ;;  %s1437_s15 = scalar_lea.hbm %s1556_s4, %s931_s12 }
  0x40   : > { %s221_s16 = scalar_lea.vmem [#allocation8], %s916_s8  ;;  %p1439_p11 = pnand %p1046_p10, %p123_p13 }
  0x41   : > { %s228_s17 = sshll.u32 %s221_s16, 4  ;;  %s1445_s29 = scalar_lea.sflag [#allocation9], %s217_s11  ;;  %s1443_s17 = int_to_ptr.vmem [resolvable:$true] %s228_s17 }
  0x42   : > { %s1187_s7 = scalar_lea.hbm %s1437_s15, 256  ;;  %p1189_p2 = pneg %p1439_p11 }
  0x43   : > { %p1188_p1 = scmp.ne.s32.totalorder %s1437_s15, %s1187_s7  ;;  %s1192_s8 = scalar_lea.hbm %s1556_s4, 512 }
  0x44   : > { %p1193_p4 = scmp.lt.s32.totalorder %s1437_s15, %s1556_s4  ;;  %p1194_p6 = scmp.lt.s32.totalorder %s1192_s8, %s1187_s7 }
  0x45   : > { %p1190_p3 = pnand %p1189_p2, %p1188_p1 }
  0x46   : > { %p1195_p8 = por %p1194_p6, %p1193_p4 }
  0x47   : > { %p1191_p5 = pneg %p1190_p3 }
  0x49   : > { %p1196_p12 = pnand %p1195_p8, %p1191_p5 }
  0x4b   : > { %1199 = shalt.err (!%p1196_p12)
}
  0x4c   : > { %s1200_s11 = scalar_lea.vmem %s1443_s17, 256  ;;  %s1296_s16 = smov [#allocation8]  }
  0x4d   : > { %p1201_p7 = scmp.ne.s32.totalorder %s1443_s17, %s1200_s11  ;;  %s1205_s23 = sshll.u32 %s1296_s16, 4  ;;  %s1206_s23 = int_to_ptr.vmem [resolvable:$false] %s1205_s23 }
  0x4e   : > { %s1207_s9 = scalar_lea.vmem %s1206_s23, 512  ;;  %p1208_p0 = scmp.lt.s32.totalorder %s1443_s17, %s1206_s23 }
  0x4f   : > { %p1203_p10 = pnand %p1201_p7, %p1189_p2  ;;  %p1209_p1 = scmp.lt.s32.totalorder %s1207_s9, %s1200_s11 }
  0x51   : > { %p1204_p13 = pneg %p1203_p10  ;;  %p1210_p3 = por %p1209_p1, %p1208_p0 }
  0x53   : > { %p1211_p9 = pnand %p1210_p3, %p1204_p13 }
  0x55   : > { %1214 = shalt.err (!%p1211_p9)
}
  0x56   : > { %s1570_s7 = smov 128   ;;  %p1571_p2 = scmp.ne.s32.totalorder %s1565_s26, 0 }
  0x57   : > { %1038 = dma.hbm_to_vmem [thread:$0]  (!%p1439_p11), %s1437_s15, 256, %s1443_s17, %s1445_s29, %s1570_s7, %s1570_s7, %s1295_s27  }
  0x58   : > { %240 = sbr.rel (%p1571_p2) target bundleno = 573 (0x23d), region = 40  ;;  %p1572_p5 = scmp.eq.s32.totalorder (!%p1571_p2), %s1352_s22, 0 }
  0x5d   : > { %1258 = dma.done.wait (%p1572_p5), [#allocation3], 8192   ;;  %p1573_p4 = pmov %p1572_p5 }
  0x5f   : > { %1260 = vsyncadd (%p1573_p4), [#allocation3], 4294959104  ;;  %p1574_p9 = pmov %p1573_p4 }
  0x60   : > { %p1575_p6 = pmov %p1573_p4 }
  0x61   : > { %1262 = dma.done.wait (%p1574_p9), [#allocation6], 8256  }
  0x62   : > { %1264 = vsyncadd (%p1575_p6), [#allocation6], 4294959040  ;;  %s1480_s23 = sand.u32 1, %s1279_s19   ;;  %p1576_p11 = scmp.ne.s32.totalorder %s1563_s24, 0 }
  0x63   : > { %s923_s26 = sshll.u32 %s1480_s23, 4  ;;  %s255_s27 = scalar_lea.sflag [#allocation9], %s1480_s23 }
  0x64   : > { %s1486_s15 = scalar_lea.vmem [#allocation8], %s923_s26 }
  0x65   : > { %1266 = dma.done.wait (%p1576_p11), %s255_s27, 256  }
  0x66   : > { %1268 = vsyncadd (%p1576_p11), %s255_s27, 4294967040  ;;  %v1297_v0 = vmov 0.0   ;;  %v350_v1 = vld [vmem:[#allocation2 + $0x1e8] sm:$0xff]  ;;  %v352_v2 = vld [vmem:[#allocation2 + $0x1f8] sm:$0xff]  ;;  %s284_s28 = scalar_lea.vmem [#allocation10], %s923_s26  ;;  %s932_s12 = sshll.u32 %s1352_s22, 8 }
  0x67   : > { %439 = vmatprep.mubr.f32.mxu0 %v1297_v0  ;;  %516 = vmatprep.mubr.f32.mxu1 %v1297_v0  ;;  %v349_v3 = vld [vmem:[#allocation2 + $0x1e0] sm:$0xff]  ;;  %v351_v4 = vld [vmem:[#allocation2 + $0x1f0] sm:$0xff]  ;;  %v346_v5 = vld [vmem:[#allocation2 + $0x1c8] sm:$0xff]  ;;  %s806_s29 = sshll.u32 %s284_s28, 4  ;;  %s1509_s14 = scalar_lea.hbm %s1557_s5, %s932_s12  ;;  %s1504_s29 = int_to_ptr.vmem [resolvable:$true] %s806_s29 }
  0x68   : > { %375 = vmatprep.subr.mxu0 %v350_v1  ;;  %452 = vmatprep.subr.mxu1 %v352_v2  ;;  %v348_v6 = vld [vmem:[#allocation2 + $0x1d8] sm:$0xff]  ;;  %v345_v7 = vld [vmem:[#allocation2 + $0x1c0] sm:$0xff]  ;;  %v347_v8 = vld [vmem:[#allocation2 + $0x1d0] sm:$0xff]  ;;  %s793_s11 = scalar_lea.sflag [#allocation4], %s1480_s23  ;;  %s1215_s16 = scalar_lea.vmem %s1504_s29, 256 }
  0x69   : > { %376 = vmatpush1.msra.mxu0 %v349_v3  ;;  %453 = vmatpush1.msra.mxu1 %v351_v4  ;;  %v342_v9 = vld [vmem:[#allocation2 + $0x1a8] sm:$0xff]  ;;  %v344_v10 = vld [vmem:[#allocation2 + $0x1b8] sm:$0xff]  ;;  %v341_v11 = vld [vmem:[#allocation2 + $0x1a0] sm:$0xff]  ;;  %p1216_p8 = scmp.ne.s32.totalorder %s1504_s29, %s1215_s16  ;;  %p1577_p12 = scmp.ne.s32.totalorder %s1568_s6, 0 }
  0x6a   : > { %377 = vmatprep.subr.mxu0 %v346_v5  ;;  %454 = vmatprep.subr.mxu1 %v348_v6  ;;  %v343_v12 = vld [vmem:[#allocation2 + $0x1b0] sm:$0xff]  ;;  %v338_v13 = vld [vmem:[#allocation2 + $0x188] sm:$0xff]  ;;  %v340_v14 = vld [vmem:[#allocation2 + $0x198] sm:$0xff]  ;;  %s1298_s22 = smov [#allocation10]  }
  0x6b   : > { %378 = vmatpush1.msra.mxu0 %v345_v7  ;;  %455 = vmatpush1.msra.mxu1 %v347_v8  ;;  %v337_v15 = vld [vmem:[#allocation2 + $0x180] sm:$0xff]  ;;  %v339_v16 = vld [vmem:[#allocation2 + $0x190] sm:$0xff]  ;;  %v334_v17 = vld [vmem:[#allocation2 + $0x168] sm:$0xff]  ;;  %p1217_p7 = pnand %p1216_p8, %p1577_p12  ;;  %s1219_s9 = sshll.u32 %s1298_s22, 4  ;;  %s1220_s9 = int_to_ptr.vmem [resolvable:$false] %s1219_s9 }
  0x6c   : > { %379 = vmatprep.subr.mxu0 %v342_v9  ;;  %456 = vmatprep.subr.mxu1 %v344_v10  ;;  %v336_v18 = vld [vmem:[#allocation2 + $0x178] sm:$0xff]  ;;  %v333_v19 = vld [vmem:[#allocation2 + $0x160] sm:$0xff]  ;;  %v335_v20 = vld [vmem:[#allocation2 + $0x170] sm:$0xff]  ;;  %s1221_s7 = scalar_lea.vmem %s1220_s9, 512  ;;  %p1222_p13 = scmp.lt.s32.totalorder %s1504_s29, %s1220_s9 }
  0x6d   : > { %380 = vmatpush1.msra.mxu0 %v341_v11  ;;  %457 = vmatpush1.msra.mxu1 %v343_v12  ;;  %v330_v21 = vld [vmem:[#allocation2 + $0x148] sm:$0xff]  ;;  %v332_v22 = vld [vmem:[#allocation2 + $0x158] sm:$0xff]  ;;  %v329_v23 = vld [vmem:[#allocation2 + $0x140] sm:$0xff]  ;;  %p1218_p10 = pneg %p1217_p7  ;;  %p1223_p0 = scmp.lt.s32.totalorder %s1221_s7, %s1215_s16 }
  0x6e   : > { %381 = vmatprep.subr.mxu0 %v338_v13  ;;  %458 = vmatprep.subr.mxu1 %v340_v14  ;;  %v331_v24 = vld [vmem:[#allocation2 + $0x150] sm:$0xff]  ;;  %v326_v25 = vld [vmem:[#allocation2 + $0x128] sm:$0xff]  ;;  %v328_v26 = vld [vmem:[#allocation2 + $0x138] sm:$0xff] }
  0x6f   : > { %382 = vmatpush1.msra.mxu0 %v337_v15  ;;  %459 = vmatpush1.msra.mxu1 %v339_v16  ;;  %v325_v27 = vld [vmem:[#allocation2 + $0x120] sm:$0xff]  ;;  %v327_v28 = vld [vmem:[#allocation2 + $0x130] sm:$0xff]  ;;  %v322_v29 = vld [vmem:[#allocation2 + $0x108] sm:$0xff]  ;;  %p1224_p1 = por %p1223_p0, %p1222_p13 }
  0x70   : > { %383 = vmatprep.subr.mxu0 %v334_v17  ;;  %460 = vmatprep.subr.mxu1 %v336_v18  ;;  %v324_v30 = vld [vmem:[#allocation2 + $0x118] sm:$0xff]  ;;  %v321_v31 = vld [vmem:[#allocation2 + $0x100] sm:$0xff]  ;;  %v323_v32 = vld [vmem:[#allocation2 + $0x110] sm:$0xff] }
  0x71   : > { %384 = vmatpush1.msra.mxu0 %v333_v19  ;;  %461 = vmatpush1.msra.mxu1 %v335_v20  ;;  %v318_v33 = vld [vmem:[#allocation2 + $0xe8] sm:$0xff]  ;;  %v320_v34 = vld [vmem:[#allocation2 + $0xf8] sm:$0xff]  ;;  %v317_v35 = vld [vmem:[#allocation2 + $0xe0] sm:$0xff]  ;;  %p1225_p3 = pnand %p1224_p1, %p1218_p10 }
  0x72   : > { %385 = vmatprep.subr.mxu0 %v330_v21  ;;  %462 = vmatprep.subr.mxu1 %v332_v22  ;;  %v319_v36 = vld [vmem:[#allocation2 + $0xf0] sm:$0xff]  ;;  %v314_v37 = vld [vmem:[#allocation2 + $0xc8] sm:$0xff]  ;;  %v316_v38 = vld [vmem:[#allocation2 + $0xd8] sm:$0xff] }
  0x73   : > { %386 = vmatpush1.msra.mxu0 %v329_v23  ;;  %463 = vmatpush1.msra.mxu1 %v331_v24  ;;  %v313_v39 = vld [vmem:[#allocation2 + $0xc0] sm:$0xff]  ;;  %v315_v40 = vld [vmem:[#allocation2 + $0xd0] sm:$0xff]  ;;  %v310_v41 = vld [vmem:[#allocation2 + $0xa8] sm:$0xff] }
  0x74   : > { %387 = vmatprep.subr.mxu0 %v326_v25  ;;  %464 = vmatprep.subr.mxu1 %v328_v26  ;;  %v312_v42 = vld [vmem:[#allocation2 + $0xb8] sm:$0xff]  ;;  %v309_v43 = vld [vmem:[#allocation2 + $0xa0] sm:$0xff]  ;;  %v311_v44 = vld [vmem:[#allocation2 + $0xb0] sm:$0xff] }
  0x75   : > { %388 = vmatpush1.msra.mxu0 %v325_v27  ;;  %465 = vmatpush1.msra.mxu1 %v327_v28  ;;  %v306_v45 = vld [vmem:[#allocation2 + $0x88] sm:$0xff]  ;;  %v308_v46 = vld [vmem:[#allocation2 + $0x98] sm:$0xff]  ;;  %v305_v47 = vld [vmem:[#allocation2 + $0x80] sm:$0xff] }
  0x76   : > { %389 = vmatprep.subr.mxu0 %v322_v29  ;;  %466 = vmatprep.subr.mxu1 %v324_v30  ;;  %v307_v48 = vld [vmem:[#allocation2 + $0x90] sm:$0xff]  ;;  %v302_v49 = vld [vmem:[#allocation2 + $0x68] sm:$0xff]  ;;  %v304_v50 = vld [vmem:[#allocation2 + $0x78] sm:$0xff] }
  0x77   : > { %390 = vmatpush1.msra.mxu0 %v321_v31  ;;  %467 = vmatpush1.msra.mxu1 %v323_v32  ;;  %v301_v51 = vld [vmem:[#allocation2 + $0x60] sm:$0xff]  ;;  %v303_v52 = vld [vmem:[#allocation2 + $0x70] sm:$0xff]  ;;  %v298_v53 = vld [vmem:[#allocation2 + $0x48] sm:$0xff] }
  0x78   : > { %391 = vmatprep.subr.mxu0 %v318_v33  ;;  %468 = vmatprep.subr.mxu1 %v320_v34  ;;  %v300_v54 = vld [vmem:[#allocation2 + $0x58] sm:$0xff]  ;;  %v297_v55 = vld [vmem:[#allocation2 + $0x40] sm:$0xff]  ;;  %v299_v56 = vld [vmem:[#allocation2 + $0x50] sm:$0xff] }
  0x79   : > { %392 = vmatpush1.msra.mxu0 %v317_v35  ;;  %469 = vmatpush1.msra.mxu1 %v319_v36  ;;  %v294_v57 = vld [vmem:[#allocation2 + $0x28] sm:$0xff]  ;;  %v296_v58 = vld [vmem:[#allocation2 + $0x38] sm:$0xff]  ;;  %v293_v59 = vld [vmem:[#allocation2 + $0x20] sm:$0xff] }
  0x7a   : > { %393 = vmatprep.subr.mxu0 %v314_v37  ;;  %470 = vmatprep.subr.mxu1 %v316_v38  ;;  %v295_v60 = vld [vmem:[#allocation2 + $0x30] sm:$0xff]  ;;  %v290_v61 = vld [vmem:[#allocation2 + $0x8] sm:$0xff]  ;;  %v292_v62 = vld [vmem:[#allocation2 + $0x18] sm:$0xff] }
  0x7b   : > { %394 = vmatpush1.msra.mxu0 %v313_v39  ;;  %471 = vmatpush1.msra.mxu1 %v315_v40  ;;  %v289_v63 = vld [vmem:[#allocation2] sm:$0xff]  ;;  %v291_v1 = vld [vmem:[#allocation2 + $0x10] sm:$0xff] }
  0x7c   : > { %395 = vmatprep.subr.mxu0 %v310_v41  ;;  %472 = vmatprep.subr.mxu1 %v312_v42  ;;  %v287_v2 = vld [vmem:[%s1486_s15] sm:$0xff]  ;;  %v600_v3 = vld [vmem:[#allocation7 + $0xf8] sm:$0xff]  ;;  %v598_v12 = vld [vmem:[#allocation7 + $0xe8] sm:$0xff] }
  0x7d   : > { %396 = vmatpush1.msra.mxu0 %v309_v43  ;;  %473 = vmatpush1.msra.mxu1 %v311_v44  ;;  %v632_v4 = vld [vmem:[#allocation7 + $0x1f8] sm:$0xff]  ;;  %v599_v8 = vld [vmem:[#allocation7 + $0xf0] sm:$0xff]  ;;  %v630_v13 = vld [vmem:[#allocation7 + $0x1e8] sm:$0xff] }
  0x7e   : > { %397 = vmatprep.subr.mxu0 %v306_v45  ;;  %474 = vmatprep.subr.mxu1 %v308_v46  ;;  %v584_v5 = vld [vmem:[#allocation7 + $0x78] sm:$0xff]  ;;  %v631_v9 = vld [vmem:[#allocation7 + $0x1f0] sm:$0xff]  ;;  %v582_v14 = vld [vmem:[#allocation7 + $0x68] sm:$0xff] }
  0x7f   : > { %398 = vmatpush1.msra.mxu0 %v305_v47  ;;  %475 = vmatpush1.msra.mxu1 %v307_v48  ;;  %v616_v6 = vld [vmem:[#allocation7 + $0x178] sm:$0xff]  ;;  %v583_v10 = vld [vmem:[#allocation7 + $0x70] sm:$0xff]  ;;  %v614_v15 = vld [vmem:[#allocation7 + $0x168] sm:$0xff] }
  0x80   : > { %399 = vmatprep.subr.mxu0 %v302_v49  ;;  %476 = vmatprep.subr.mxu1 %v304_v50  ;;  %v288_v7 = vld [vmem:[%s1486_s15 + $0x8] sm:$0xff]  ;;  %v615_v11 = vld [vmem:[#allocation7 + $0x170] sm:$0xff]  ;;  %v629_v16 = vld [vmem:[#allocation7 + $0x1e0] sm:$0xff] }
  0x81   : > { %400 = vmatpush1.msra.mxu0 %v301_v51  ;;  %477 = vmatpush1.msra.mxu1 %v303_v52  ;;  %v581_v17 = vld [vmem:[#allocation7 + $0x60] sm:$0xff]  ;;  %v596_v19 = vld [vmem:[#allocation7 + $0xd8] sm:$0xff]  ;;  %v595_v23 = vld [vmem:[#allocation7 + $0xd0] sm:$0xff] }
  0x82   : > { %401 = vmatprep.subr.mxu0 %v298_v53  ;;  %478 = vmatprep.subr.mxu1 %v300_v54  ;;  %v613_v18 = vld [vmem:[#allocation7 + $0x160] sm:$0xff]  ;;  %v628_v20 = vld [vmem:[#allocation7 + $0x1d8] sm:$0xff]  ;;  %v627_v24 = vld [vmem:[#allocation7 + $0x1d0] sm:$0xff] }
  0x83   : > { %402 = vmatpush1.msra.mxu0 %v297_v55  ;;  %479 = vmatpush1.msra.mxu1 %v299_v56  ;;  %v580_v21 = vld [vmem:[#allocation7 + $0x58] sm:$0xff]  ;;  %v579_v25 = vld [vmem:[#allocation7 + $0x50] sm:$0xff]  ;;  %v594_v27 = vld [vmem:[#allocation7 + $0xc8] sm:$0xff] }
  0x84   : > { %403 = vmatprep.subr.mxu0 %v294_v57  ;;  %480 = vmatprep.subr.mxu1 %v296_v58  ;;  %v612_v22 = vld [vmem:[#allocation7 + $0x158] sm:$0xff]  ;;  %v611_v26 = vld [vmem:[#allocation7 + $0x150] sm:$0xff]  ;;  %v626_v28 = vld [vmem:[#allocation7 + $0x1c8] sm:$0xff] }
  0x85   : > { %404 = vmatpush1.msra.mxu0 %v293_v59  ;;  %481 = vmatpush1.msra.mxu1 %v295_v60  ;;  %v578_v29 = vld [vmem:[#allocation7 + $0x48] sm:$0xff]  ;;  %v593_v31 = vld [vmem:[#allocation7 + $0xc0] sm:$0xff]  ;;  %v592_v35 = vld [vmem:[#allocation7 + $0xb8] sm:$0xff] }
  0x86   : > { %405 = vmatprep.subr.mxu0 %v290_v61  ;;  %482 = vmatprep.subr.mxu1 %v292_v62  ;;  %v610_v30 = vld [vmem:[#allocation7 + $0x148] sm:$0xff]  ;;  %v625_v32 = vld [vmem:[#allocation7 + $0x1c0] sm:$0xff]  ;;  %v624_v36 = vld [vmem:[#allocation7 + $0x1b8] sm:$0xff] }
  0x87   : > { %406 = vmatpush1.msra.mxu0 %v289_v63  ;;  %483 = vmatpush1.msra.mxu1 %v291_v1  ;;  %v577_v33 = vld [vmem:[#allocation7 + $0x40] sm:$0xff]  ;;  %v576_v37 = vld [vmem:[#allocation7 + $0x38] sm:$0xff]  ;;  %v591_v39 = vld [vmem:[#allocation7 + $0xb0] sm:$0xff] }
  0x88   : > { %440 = vmatmul.mubr.f32.vlgmr.msra.gmra.mxu0 %v287_v2  ;;  %517 = vmatmul.mubr.f32.vlgmr.msra.gmra.mxu1 %v287_v2  ;;  %v609_v34 = vld [vmem:[#allocation7 + $0x140] sm:$0xff]  ;;  %v608_v38 = vld [vmem:[#allocation7 + $0x138] sm:$0xff]  ;;  %v623_v40 = vld [vmem:[#allocation7 + $0x1b0] sm:$0xff] }
  0x89   : > { %445 = vmatprep.mubr.f32.mxu0 %v1297_v0  ;;  %522 = vmatprep.mubr.f32.mxu1 %v1297_v0  ;;  %v597_v0 = vld [vmem:[#allocation7 + $0xe0] sm:$0xff]  ;;  %v575_v41 = vld [vmem:[#allocation7 + $0x30] sm:$0xff]  ;;  %v590_v43 = vld [vmem:[#allocation7 + $0xa8] sm:$0xff] }
  0x8a   : > { %933 = vmatprep.subr.mxu0 %v600_v3  ;;  %971 = vmatprep.subr.mxu1 %v632_v4  ;;  %v607_v42 = vld [vmem:[#allocation7 + $0x130] sm:$0xff]  ;;  %v622_v44 = vld [vmem:[#allocation7 + $0x1a8] sm:$0xff]  ;;  %v589_v47 = vld [vmem:[#allocation7 + $0xa0] sm:$0xff]  ;;  %v355_v4 = vlaneseq }
  0x8b   : > { %934 = vmatpush3.msra.mxu0 %v584_v5  ;;  %972 = vmatpush3.msra.mxu1 %v616_v6  ;;  %v574_v45 = vld [vmem:[#allocation7 + $0x28] sm:$0xff]  ;;  %v621_v48 = vld [vmem:[#allocation7 + $0x1a0] sm:$0xff]  ;;  %v588_v51 = vld [vmem:[#allocation7 + $0x98] sm:$0xff] }
  0x8c   : > { %446 = vmatmul.mubr.f32.gmra.mxu0 %v288_v7  ;;  %523 = vmatmul.mubr.f32.gmra.mxu1 %v288_v7  ;;  %v606_v46 = vld [vmem:[#allocation7 + $0x128] sm:$0xff]  ;;  %v573_v49 = vld [vmem:[#allocation7 + $0x20] sm:$0xff]  ;;  %v620_v52 = vld [vmem:[#allocation7 + $0x198] sm:$0xff]  ;;  %v356_v5 = vshrl.u32 %v355_v4, 7 }
  0x8d   : > { %935 = vmatprep.subr.mxu0 %v599_v8  ;;  %973 = vmatprep.subr.mxu1 %v631_v9  ;;  %v605_v50 = vld [vmem:[#allocation7 + $0x120] sm:$0xff]  ;;  %v572_v53 = vld [vmem:[#allocation7 + $0x18] sm:$0xff]  ;;  %v587_v55 = vld [vmem:[#allocation7 + $0x90] sm:$0xff] }
  0x8e   : > { %936 = vmatpush3.msra.mxu0 %v583_v10  ;;  %974 = vmatpush3.msra.mxu1 %v615_v11  ;;  %v604_v54 = vld [vmem:[#allocation7 + $0x118] sm:$0xff]  ;;  %v619_v56 = vld [vmem:[#allocation7 + $0x190] sm:$0xff]  ;;  %v586_v59 = vld [vmem:[#allocation7 + $0x88] sm:$0xff]  ;;  %v357_v6 = vsub.s32 0, %v356_v5  ;;  %v365_v7 = vsub.s32 2, %v356_v5  ;;  %v361_v9 = vsub.s32 1, %v356_v5 }
  0x8f   : > { %937 = vmatprep.subr.mxu0 %v598_v12  ;;  %975 = vmatprep.subr.mxu1 %v630_v13  ;;  %v571_v57 = vld [vmem:[#allocation7 + $0x10] sm:$0xff]  ;;  %v618_v60 = vld [vmem:[#allocation7 + $0x188] sm:$0xff]  ;;  %v585_v63 = vld [vmem:[#allocation7 + $0x80] sm:$0xff]  ;;  %v369_v10 = vsub.s32 3, %v356_v5 }
  0x90   : > { %938 = vmatpush3.msra.mxu0 %v582_v14  ;;  %976 = vmatpush3.msra.mxu1 %v614_v15  ;;  %v603_v58 = vld [vmem:[#allocation7 + $0x110] sm:$0xff]  ;;  %v570_v61 = vld [vmem:[#allocation7 + $0x8] sm:$0xff]  ;;  %v617_v1 = vld [vmem:[#allocation7 + $0x180] sm:$0xff] }
  0x91   : > { %939 = vmatprep.subr.mxu0 %v597_v0  ;;  %977 = vmatprep.subr.mxu1 %v629_v16  ;;  %v602_v62 = vld [vmem:[#allocation7 + $0x108] sm:$0xff]  ;;  %v569_v2 = vld [vmem:[#allocation7] sm:$0xff]  ;;  %v353_v8 = vld [vmem:[#allocation5] sm:$0xf] }
  0x92   : > { %940 = vmatpush3.msra.mxu0 %v581_v17  ;;  %978 = vmatpush3.msra.mxu1 %v613_v18  ;;  %v601_v3 = vld [vmem:[#allocation7 + $0x100] sm:$0xff]  ;;  %v358_v11 = vrot.slane %v353_v8, %v357_v6  ;;  %v366_v12 = vrot.slane %v353_v8, %v365_v7  ;;  %v362_v15 = vrot.slane %v353_v8, %v361_v9  ;;  %v925_v9 = vld [vmem:[%s1555_s3] ss:$0 sm:$0xff] }
  0x93   : > { %941 = vmatprep.subr.mxu0 %v596_v19  ;;  %979 = vmatprep.subr.mxu1 %v628_v20  ;;  %v370_v0 = vrot.slane %v353_v8, %v369_v10 }
  0x94   : > { %942 = vmatpush3.msra.mxu0 %v580_v21  ;;  %980 = vmatpush3.msra.mxu1 %v612_v22 }
  0x95   : > { %943 = vmatprep.subr.mxu0 %v595_v23  ;;  %981 = vmatprep.subr.mxu1 %v627_v24 }
  0x96   : > { %944 = vmatpush3.msra.mxu0 %v579_v25  ;;  %982 = vmatpush3.msra.mxu1 %v611_v26 }
  0x97   : > { %945 = vmatprep.subr.mxu0 %v594_v27  ;;  %983 = vmatprep.subr.mxu1 %v626_v28 }
  0x98   : > { %946 = vmatpush3.msra.mxu0 %v578_v29  ;;  %984 = vmatpush3.msra.mxu1 %v610_v30 }
  0x99   : > { %947 = vmatprep.subr.mxu0 %v593_v31  ;;  %985 = vmatprep.subr.mxu1 %v625_v32 }
  0x9a   : > { %948 = vmatpush3.msra.mxu0 %v577_v33  ;;  %986 = vmatpush3.msra.mxu1 %v609_v34 }
  0x9b   : > { %949 = vmatprep.subr.mxu0 %v592_v35  ;;  %987 = vmatprep.subr.mxu1 %v624_v36 }
  0x9c   : > { %950 = vmatpush3.msra.mxu0 %v576_v37  ;;  %988 = vmatpush3.msra.mxu1 %v608_v38 }
  0x9d   : > { %951 = vmatprep.subr.mxu0 %v591_v39  ;;  %989 = vmatprep.subr.mxu1 %v623_v40 }
  0x9e   : > { %952 = vmatpush3.msra.mxu0 %v575_v41  ;;  %990 = vmatpush3.msra.mxu1 %v607_v42 }
  0x9f   : > { %953 = vmatprep.subr.mxu0 %v590_v43  ;;  %991 = vmatprep.subr.mxu1 %v622_v44 }
  0xa0   : > { %954 = vmatpush3.msra.mxu0 %v574_v45  ;;  %992 = vmatpush3.msra.mxu1 %v606_v46 }
  0xa1   : > { %955 = vmatprep.subr.mxu0 %v589_v47  ;;  %993 = vmatprep.subr.mxu1 %v621_v48 }
  0xa2   : > { %956 = vmatpush3.msra.mxu0 %v573_v49  ;;  %994 = vmatpush3.msra.mxu1 %v605_v50 }
  0xa3   : > { %957 = vmatprep.subr.mxu0 %v588_v51  ;;  %995 = vmatprep.subr.mxu1 %v620_v52 }
  0xa4   : > { %958 = vmatpush3.msra.mxu0 %v572_v53  ;;  %996 = vmatpush3.msra.mxu1 %v604_v54 }
  0xa5   : > { %959 = vmatprep.subr.mxu0 %v587_v55  ;;  %997 = vmatprep.subr.mxu1 %v619_v56 }
  0xa6   : > { %960 = vmatpush3.msra.mxu0 %v571_v57  ;;  %998 = vmatpush3.msra.mxu1 %v603_v58 }
  0xa7   : > { %961 = vmatprep.subr.mxu0 %v586_v59  ;;  %999 = vmatprep.subr.mxu1 %v618_v60 }
  0xa8   : > { %962 = vmatpush3.msra.mxu0 %v570_v61  ;;  %1000 = vmatpush3.msra.mxu1 %v602_v62 }
  0xa9   : > { %963 = vmatprep.subr.mxu0 %v585_v63  ;;  %1001 = vmatprep.subr.mxu1 %v617_v1 }
  0xaa   : > { %964 = vmatpush3.msra.mxu0 %v569_v2  ;;  %1002 = vmatpush3.msra.mxu1 %v601_v3 }
 0x148   : > { %v441_v13 = vpop.f32.mrf.mxu0  ;;  %v518_v14 = vpop.f32.mrf.mxu1 }
 0x149   : > { %v442_v16 = vadd.f32 %v441_v13, %v358_v11  ;;  %v519_v17 = vadd.f32 %v518_v14, %v366_v12 }
 0x14a   : > { %v443_v18 = vpop.f32.mrf.mxu0  ;;  %v520_v19 = vpop.f32.mrf.mxu1 }
 0x14b   : > { %v537_v20 = vmul.f32 0.70710677, %v442_v16  ;;  %v539_v21 = vmul.f32 0.70710677, %v519_v17  ;;  %v444_v22 = vadd.f32 %v443_v18, %v362_v15  ;;  %v521_v23 = vadd.f32 %v520_v19, %v370_v0 }
 0x14c   : > { %v447_v24 = vpop.f32.mrf.mxu0  ;;  %v524_v25 = vpop.f32.mrf.mxu1  ;;  %v529_v47 = vmul.f32 0.5, %v442_v16  ;;  %v531_v51 = vmul.f32 0.5, %v519_v17 }
 0x14d   : > { %1093 = verf.f32 %v537_v20  ;;  %v448_v26 = vadd.f32 %v447_v24, %v358_v11  ;;  %v525_v27 = vadd.f32 %v524_v25, %v366_v12  ;;  %v538_v28 = vmul.f32 0.70710677, %v444_v22 }
 0x14e   : > { %1095 = verf.f32 %v539_v21  ;;  %v449_v29 = vpop.f32.mrf.mxu0  ;;  %v526_v30 = vpop.f32.mrf.mxu1  ;;  %v540_v31 = vmul.f32 0.70710677, %v521_v23  ;;  %v530_v44 = vmul.f32 0.5, %v444_v22  ;;  %v532_v48 = vmul.f32 0.5, %v521_v23 }
 0x14f   : > { %v541_v32 = vmul.f32 0.70710677, %v448_v26  ;;  %1097 = verf.f32 %v538_v28  ;;  %v543_v33 = vmul.f32 0.70710677, %v525_v27  ;;  %v450_v34 = vadd.f32 %v449_v29, %v362_v15 }
 0x150   : > { %v527_v35 = vadd.f32 %v526_v30, %v370_v0  ;;  %1099 = verf.f32 %v540_v31  ;;  %v533_v62 = vmul.f32 0.5, %v448_v26  ;;  %v535_v2 = vmul.f32 0.5, %v525_v27 }
 0x151   : > { %1101 = verf.f32 %v541_v32  ;;  %v542_v36 = vmul.f32 0.70710677, %v450_v34  ;;  %v534_v59 = vmul.f32 0.5, %v450_v34 }
 0x152   : > { %1103 = verf.f32 %v543_v33  ;;  %v544_v37 = vmul.f32 0.70710677, %v527_v35  ;;  %v536_v63 = vmul.f32 0.5, %v527_v35 }
 0x153   : > { %1105 = verf.f32 %v542_v36 }
 0x154   : > { %1107 = verf.f32 %v544_v37 }
 0x15a   : > { %v1094_v38 = vpop.eup %1093 }
 0x15b   : > { %v1096_v39 = vpop.eup %1095  ;;  %v553_v41 = vadd.f32 1.0, %v1094_v38 }
 0x15c   : > { %v1098_v40 = vpop.eup %1097  ;;  %v555_v43 = vadd.f32 1.0, %v1096_v39 }
 0x15d   : > { %v1100_v42 = vpop.eup %1099  ;;  %v554_v45 = vadd.f32 1.0, %v1098_v40  ;;  %v561_v54 = vmul.f32 %v553_v41, %v529_v47 }
 0x15e   : > { %v1102_v46 = vpop.eup %1101  ;;  %v556_v49 = vadd.f32 1.0, %v1100_v42  ;;  %v563_v58 = vmul.f32 %v555_v43, %v531_v51 }
 0x15f   : > { %v1104_v50 = vpop.eup %1103  ;;  %v562_v52 = vmul.f32 %v554_v45, %v530_v44  ;;  %v557_v56 = vadd.f32 1.0, %v1102_v46 }
 0x160   : > { %v1106_v53 = vpop.eup %1105  ;;  %v564_v55 = vmul.f32 %v556_v49, %v532_v48  ;;  %v559_v61 = vadd.f32 1.0, %v1104_v50 }
 0x161   : > { %v1108_v57 = vpop.eup %1107  ;;  %704 = vmatprep.mubr.f32.mxu0 %v562_v52  ;;  %v558_v60 = vadd.f32 1.0, %v1106_v53  ;;  %v565_v5 = vmul.f32 %v557_v56, %v533_v62 }
 0x162   : > { %779 = vmatprep.mubr.f32.mxu1 %v564_v55  ;;  %705 = vmatmul.mubr.f32.vlgmr.msra.gmra.mxu0 %v561_v54  ;;  %v560_v1 = vadd.f32 1.0, %v1108_v57  ;;  %v567_v6 = vmul.f32 %v559_v61, %v535_v2 }
 0x163   : > { %780 = vmatmul.mubr.f32.vlgmr.msra.gmra.mxu1 %v563_v58  ;;  %v566_v3 = vmul.f32 %v558_v60, %v534_v59 }
 0x164   : > { %v568_v4 = vmul.f32 %v560_v1, %v536_v63 }
 0x165   : > { %709 = vmatprep.mubr.f32.mxu0 %v566_v3 }
 0x166   : > { %784 = vmatprep.mubr.f32.mxu1 %v568_v4  ;;  %710 = vmatmul.mubr.f32.gmra.mxu0 %v565_v5 }
 0x167   : > { %785 = vmatmul.mubr.f32.gmra.mxu1 %v567_v6 }
 0x222   : > { %v965_v7 = vpop.f32.mrf.mxu0 }
 0x223   : > { %v1003_v8 = vpop.f32.mrf.mxu1 }
 0x224   : > { %v966_v10 = vpop.f32.mrf.mxu0 }
 0x225   : > { %v967_v11 = vadd.f32 %v966_v10, %v965_v7  ;;  %v1004_v12 = vpop.f32.mrf.mxu1 }
 0x226   : > { %v968_v13 = vpop.f32.mrf.mxu0  ;;  %v1005_v15 = vadd.f32 %v1004_v12, %v1003_v8 }
 0x227   : > { %v707_v14 = vadd.f32 %v967_v11, %v925_v9  ;;  %v1006_v0 = vpop.f32.mrf.mxu1 }
 0x228   : > { %v969_v16 = vpop.f32.mrf.mxu0 }
 0x229   : > { %v782_v17 = vadd.f32 %v1005_v15, %v707_v14  ;;  %v970_v18 = vadd.f32 %v969_v16, %v968_v13  ;;  %v1007_v19 = vpop.f32.mrf.mxu1 }
 0x22a   : > { %v1008_v21 = vadd.f32 %v1007_v19, %v1006_v0 }
 0x22b   : > { %790 = vst [vmem:[%s284_s28] sm:$0xff] %v782_v17  ;;  %v712_v20 = vadd.f32 %v970_v18, %v925_v9 }
 0x22d   : > { %v787_v22 = vadd.f32 %v1008_v21, %v712_v20 }
 0x22f   : > { %791 = vst [vmem:[%s284_s28 + $0x8] sm:$0xff] %v787_v22 }
 0x230   : > { %1228 = shalt.err (!%p1225_p3)
}
 0x231   : > { %s1229_s26 = scalar_lea.hbm %s1509_s14, 256  ;;  %s1233_s24 = scalar_lea.hbm %s1557_s5, 512 }
 0x232   : > { %p1230_p2 = scmp.ne.s32.totalorder %s1509_s14, %s1229_s26  ;;  %p1234_p9 = scmp.lt.s32.totalorder %s1509_s14, %s1557_s5 }
 0x233   : > { %p1235_p6 = scmp.lt.s32.totalorder %s1233_s24, %s1229_s26 }
 0x234   : > { %p1231_p5 = pnand %p1230_p2, %p1577_p12 }
 0x235   : > { %p1236_p11 = por %p1235_p6, %p1234_p9 }
 0x236   : > { %p1232_p4 = pneg %p1231_p5 }
 0x238   : > { %p1237_p8 = pnand %p1236_p11, %p1232_p4 }
 0x23a   : > { %1240 = shalt.err (!%p1237_p8)
}
 0x23b   : > { %s1299_s12 = smov 128   ;;  %s1300_s8 = smov 8  }
 0x23c   : > { %1023 = dma.vmem_to_hbm [thread:$0]  (%p1577_p12), %s1504_s29, 256, %s1509_s14, %s793_s11, %s1299_s12, %s1299_s12, %s1300_s8  }
 0x23d PF: > { %s821_s13 = sand.u32 1, %s1275_s18   ;;  %p1578_p7 = scmp.ne.s32.totalorder %s1564_s25, 0 }
 0x23e   : > { %p1579_p10 = scmp.ge.s32.totalorder %s1287_s21, 2  ;;  %s822_s16 = scalar_lea.sflag [#allocation4], %s821_s13 }
 0x240   : > { %p1040_p13 = pnand %p1579_p10, %p1578_p7 }
 0x242   : > { %p1041_p0 = pneg %p1040_p13 }
 0x244   : > { %1270 = dma.done.wait (%p1041_p0), %s822_s16, 256  }
 0x245   : > { %1272 = vsyncadd (%p1041_p0), %s822_s16, 4294967040  ;;  %p20_p1 = scmp.ge.s32.totalorder %s1414_s30, 4   ;;  %s1580_s18 = smov %s1279_s19 }
 0x246   : > { %s1581_s19 = smov %s1283_s20  ;;  %s1582_s20 = smov %s1424_s10 }
 0x247   : > { %s1583_s21 = smov %s1414_s30  ;;  %22 = sbr.rel (!%p20_p1) target bundleno = 7 (0x7), region = 98 }
 0x24c   :  { %827 = vsyncpa [#allocation3], 1 }
 0x24d   :  { %829 = vsyncpa [#allocation3 + $0x1], 1 }
 0x24e   :  { %830 = vsyncpa [#allocation6], 1 }
 0x24f   :  { %831 = vsyncpa [#allocation9], 1 }
 0x250   :  { %833 = vsyncpa [#allocation9 + $0x1], 1 }
 0x251   :  { %834 = vsyncpa [#allocation4], 1 }
 0x252   :  { %836 = vsyncpa [#allocation4 + $0x1], 1 }

</bundles_post_ra>
